<compile_context>
chip_gen: v6e
topology: v6e:2x2x1
jax: 0.10.0
libtpu: 0.0.40
codegen_flags: <defaults>
</compile_context>

<pallas_src>
import functools

import jax
import jax.numpy as jnp
from jax import lax
from jax.experimental import pallas as pl
from jax.experimental.pallas import tpu as pltpu

BN_EPS = 1e-5
_VMEM_LIMIT = 40 * 1024 * 1024          # scoped VMEM limit (safe on v5e/v6e/v7x)
_FUSED_VMEM_BUDGET = 26 * 1024 * 1024   # conservative budget for the fused path


def _round_up(x, m):
    return (x + m - 1) // m * m


# ---------------------------------------------------------------------------
# Fused single-pass kernel: grid = (N tiles, K tiles).  The (Mp, tn) output
# block index is (0, j) -> resident across the whole K sweep, so the MXU
# accumulates directly into it (bias pre-loaded at k==0).  At the last K step
# the full-batch statistics, affine and ReLU are applied in place.
# ---------------------------------------------------------------------------
def _fused_kernel(x_ref, w_ref, b_ref, g_ref, be_ref, o_ref, *, batch, mask_rows):
    k = pl.program_id(1)
    nk = pl.num_programs(1)

    @pl.when(k == 0)
    def _():
        # Init the resident output block with the broadcast bias: no epilogue add.
        o_ref[...] = jnp.broadcast_to(b_ref[...], o_ref.shape)

    # MXU: bf16 operands, f32 accumulation directly into the resident block.
    o_ref[...] += jnp.dot(x_ref[...], w_ref[...],
                          preferred_element_type=jnp.float32)

    @pl.when(k == nk - 1)
    def _():
        y = o_ref[...]                                   # (Mp, tn) f32, bias included
        if mask_rows:  # static: only pay for the mask when padded rows exist
            rows = lax.broadcasted_iota(jnp.int32, (y.shape[0], 1), 0)
            yv = jnp.where(rows < batch, y, 0.0)
        else:
            yv = y
        inv_n = 1.0 / batch
        mean = jnp.sum(yv, axis=0, keepdims=True) * inv_n
        var = jnp.maximum(jnp.sum(yv * yv, axis=0, keepdims=True) * inv_n
                          - mean * mean, 0.0)
        inv_std = lax.rsqrt(var + BN_EPS)                # EUP slot
        scale = g_ref[...] * inv_std
        shift = be_ref[...] - mean * scale
        o_ref[...] = jnp.maximum(y * scale + shift, 0.0)


# ---------------------------------------------------------------------------
# Two-phase fallback, phase 1: tiled matmul (bf16 MXU, f32 acc seeded with the
# bias) + per-feature sum / sum-of-squares.  The stats blocks map to (0, j) so
# they stay resident across the M x K sweep.  The intermediate y is stored bf16.
# ---------------------------------------------------------------------------
def _matmul_stats_kernel(x_ref, w_ref, b_ref, y_ref, sum_ref, sq_ref, acc_ref,
                         *, batch, tm):
    i = pl.program_id(1)          # M tile index
    k = pl.program_id(2)          # K tile index (reduction, innermost)
    nk = pl.num_programs(2)

    @pl.when(k == 0)
    def _():
        acc_ref[...] = jnp.broadcast_to(b_ref[...], acc_ref.shape)

    @pl.when(jnp.logical_and(i == 0, k == 0))
    def _():
        sum_ref[...] = jnp.zeros_like(sum_ref)
        sq_ref[...] = jnp.zeros_like(sq_ref)

    acc_ref[...] += jnp.dot(x_ref[...], w_ref[...],
                            preferred_element_type=jnp.float32)

    @pl.when(k == nk - 1)
    def _():
        y = acc_ref[...]                        # f32, bias already included
        y_ref[...] = y.astype(y_ref.dtype)      # bf16 intermediate store
        needs_mask = (i + 1) * tm > batch       # only the last M tile pays

        @pl.when(needs_mask)
        def _():
            rows = i * tm + lax.broadcasted_iota(jnp.int32, (tm, 1), 0)
            yv = jnp.where(rows < batch, y, 0.0)
            sum_ref[...] += jnp.sum(yv, axis=0, keepdims=True)
            sq_ref[...] += jnp.sum(yv * yv, axis=0, keepdims=True)

        @pl.when(jnp.logical_not(needs_mask))
        def _():
            sum_ref[...] += jnp.sum(y, axis=0, keepdims=True)
            sq_ref[...] += jnp.sum(y * y, axis=0, keepdims=True)


# ---------------------------------------------------------------------------
# Two-phase fallback, phase 2: normalize bf16 y with the full-batch statistics,
# affine (gamma/beta), ReLU.  Pure streaming kernel.
# ---------------------------------------------------------------------------
def _bn_relu_kernel(y_ref, sum_ref, sq_ref, gamma_ref, beta_ref, o_ref, *, batch):
    inv_n = 1.0 / batch
    mean = sum_ref[...] * inv_n                                 # (1, tn)
    var = jnp.maximum(sq_ref[...] * inv_n - mean * mean, 0.0)   # biased variance
    inv_std = lax.rsqrt(var + BN_EPS)
    scale = gamma_ref[...] * inv_std
    shift = beta_ref[...] - mean * scale
    y = y_ref[...].astype(jnp.float32)
    o_ref[...] = jnp.maximum(y * scale + shift, 0.0).astype(o_ref.dtype)


@functools.partial(jax.jit, static_argnames=("tm", "tn", "tk", "fused"))
def linear_bn_relu(x, weight, bias, gamma, beta, *,
                   tm=1024, tn=512, tk=512, fused=None):
    """relu(batchnorm1d(x @ weight.T + bias)) with training-mode batch stats.

    Uses the fused single-pass kernel whenever the padded batch column fits the
    VMEM budget, otherwise falls back to the two-phase (matmul+stats, then BN+ReLU)
    pipeline.  The whole wrapper is jitted so the pad / transpose / bf16 cast of
    the weight fuses into the surrounding program (hoist/cache it once per layer
    in a real model instead of re-materializing per call).
    """
    B, Cin = x.shape
    Cout = weight.shape[0]

    # Lane/sublane-aligned tile clamps (bf16 native tiling is (16, 128)).
    tn = min(tn, _round_up(Cout, 128))
    tk = min(tk, _round_up(Cin, 128))
    N = _round_up(Cout, tn)
    K = _round_up(Cin, tk)
    Mp = _round_up(B, 16)

    # Fused-path VMEM estimate (conservative: 2x on the resident output block).
    fused_bytes = (2 * Mp * tk * 2        # x double-buffer (bf16)
                   + 2 * tk * tn * 2      # w double-buffer (bf16)
                   + 2 * Mp * tn * 4      # resident f32 output block
                   + 6 * tn * 4)          # bias / gamma / beta vectors
    if fused is None:
        fused = fused_bytes <= _FUSED_VMEM_BUDGET

    # Pad + cast the MXU operands to bf16; pre-transpose the weight once.
    wp = jnp.pad(weight.T, ((0, K - Cin), (0, N - Cout))).astype(jnp.bfloat16)
    bp = jnp.pad(bias, (0, N - Cout)).reshape(1, N).astype(jnp.float32)
    gp = jnp.pad(gamma, (0, N - Cout)).reshape(1, N).astype(jnp.float32)
    bep = jnp.pad(beta, (0, N - Cout)).reshape(1, N).astype(jnp.float32)

    if fused:
        xp = jnp.pad(x, ((0, Mp - B), (0, K - Cin))).astype(jnp.bfloat16)
        nj, nkk = N // tn, K // tk
        out = pl.pallas_call(
            functools.partial(_fused_kernel, batch=B, mask_rows=Mp > B),
            out_shape=jax.ShapeDtypeStruct((Mp, N), jnp.float32),
            grid_spec=pltpu.PrefetchScalarGridSpec(
                num_scalar_prefetch=0,
                grid=(nj, nkk),
                in_specs=[
                    pl.BlockSpec((Mp, tk), lambda j, k: (0, k)),   # x (full batch)
                    pl.BlockSpec((tk, tn), lambda j, k: (k, j)),   # weight.T
                    pl.BlockSpec((1, tn), lambda j, k: (0, j)),    # bias
                    pl.BlockSpec((1, tn), lambda j, k: (0, j)),    # gamma
                    pl.BlockSpec((1, tn), lambda j, k: (0, j)),    # beta
                ],
                out_specs=pl.BlockSpec((Mp, tn), lambda j, k: (0, j)),
            ),
            compiler_params=pltpu.CompilerParams(
                dimension_semantics=("parallel", "arbitrary"),
                vmem_limit_bytes=_VMEM_LIMIT),
            cost_estimate=pl.CostEstimate(
                flops=2 * Mp * N * K,
                transcendentals=N,
                bytes_accessed=2 * Mp * K * (N // tn) + 2 * K * N + 4 * Mp * N + 12 * N),
        )(xp, wp, bp, gp, bep)
        if Mp == B and N == Cout:
            return out
        return out[:B, :Cout]

    # ----------------------- two-phase fallback (large B) -----------------------
    tm = min(tm, _round_up(B, 16))
    M = _round_up(B, tm)
    xp = jnp.pad(x, ((0, M - B), (0, K - Cin))).astype(jnp.bfloat16)
    nj, ni, nkk = N // tn, M // tm, K // tk

    y, fsum, fsq = pl.pallas_call(
        functools.partial(_matmul_stats_kernel, batch=B, tm=tm),
        out_shape=(
            jax.ShapeDtypeStruct((M, N), jnp.bfloat16),   # pre-BN activations (bf16)
            jax.ShapeDtypeStruct((1, N), jnp.float32),    # per-feature sum
            jax.ShapeDtypeStruct((1, N), jnp.float32),    # per-feature sum of squares
        ),
        grid_spec=pltpu.PrefetchScalarGridSpec(
            num_scalar_prefetch=0,
            grid=(nj, ni, nkk),
            in_specs=[
                pl.BlockSpec((tm, tk), lambda j, i, k: (i, k)),   # x
                pl.BlockSpec((tk, tn), lambda j, i, k: (k, j)),   # weight.T
                pl.BlockSpec((1, tn), lambda j, i, k: (0, j)),    # bias
            ],
            out_specs=(
                pl.BlockSpec((tm, tn), lambda j, i, k: (i, j)),   # y
                pl.BlockSpec((1, tn), lambda j, i, k: (0, j)),    # sum   (resident)
                pl.BlockSpec((1, tn), lambda j, i, k: (0, j)),    # sumsq (resident)
            ),
            scratch_shapes=[pltpu.VMEM((tm, tn), jnp.float32)],
        ),
        compiler_params=pltpu.CompilerParams(
            dimension_semantics=("parallel", "arbitrary", "arbitrary"),
            vmem_limit_bytes=_VMEM_LIMIT),
        cost_estimate=pl.CostEstimate(
            flops=2 * M * N * K,
            transcendentals=0,
            bytes_accessed=2 * M * K * nj + 2 * K * N * ni + 2 * M * N + 12 * N),
    )(xp, wp, bp)

    out = pl.pallas_call(
        functools.partial(_bn_relu_kernel, batch=B),
        out_shape=jax.ShapeDtypeStruct((M, N), jnp.float32),
        grid_spec=pltpu.PrefetchScalarGridSpec(
            num_scalar_prefetch=0,
            grid=(ni, nj),
            in_specs=[
                pl.BlockSpec((tm, tn), lambda i, j: (i, j)),   # y (bf16)
                pl.BlockSpec((1, tn), lambda i, j: (0, j)),    # sum
                pl.BlockSpec((1, tn), lambda i, j: (0, j)),    # sumsq
                pl.BlockSpec((1, tn), lambda i, j: (0, j)),    # gamma
                pl.BlockSpec((1, tn), lambda i, j: (0, j)),    # beta
            ],
            out_specs=pl.BlockSpec((tm, tn), lambda i, j: (i, j)),
        ),
        compiler_params=pltpu.CompilerParams(
            dimension_semantics=("parallel", "parallel"),
            vmem_limit_bytes=_VMEM_LIMIT),
    )(y, fsum, fsq, gp, bep)

    if M == B and N == Cout:
        return out
    return out[:B, :Cout]


def reference(x, weight, bias, gamma, beta, *, bf16_intermediate=False):
    # Mirrors the kernel numerics: bf16 MXU inputs, f32 accumulation; optionally a
    # bf16-rounded intermediate (two-phase path) with stats taken from the f32 values.
    y = jnp.dot(x.astype(jnp.bfloat16), weight.astype(jnp.bfloat16).T,
                preferred_element_type=jnp.float32) + bias
    mean = jnp.mean(y, axis=0, keepdims=True)
    var = jnp.mean((y - mean) ** 2, axis=0, keepdims=True)
    if bf16_intermediate:
        y = y.astype(jnp.bfloat16).astype(jnp.float32)
    y_hat = (y - mean) / jnp.sqrt(var + BN_EPS)
    return jnp.maximum(gamma * y_hat + beta, 0.0)


def _make_inputs(key, B, Cin, Cout):
    k_x, k_w, k_b = jax.random.split(key, 3)
    x = jax.random.normal(k_x, (B, Cin), dtype=jnp.float32)
    bound = 1.0 / (Cin ** 0.5)   # torch.nn.Linear default init bounds
    weight = jax.random.uniform(k_w, (Cout, Cin), minval=-bound, maxval=bound,
                                dtype=jnp.float32)
    bias = jax.random.uniform(k_b, (Cout,), minval=-bound, maxval=bound,
                              dtype=jnp.float32)
    gamma = jnp.ones((Cout,), dtype=jnp.float32)   # BatchNorm1d weight
    beta = jnp.zeros((Cout,), dtype=jnp.float32)   # BatchNorm1d bias
    return x, weight, bias, gamma, beta


if __name__ == "__main__":
    key = jax.random.PRNGKey(0)
    k1, k2, k3 = jax.random.split(key, 3)

    # Case 1: tiny shapes matching the original module test -> single-tile fused path.
    x, w, b, g, be = _make_inputs(k1, 8, 32, 16)
    out = jax.block_until_ready(linear_bn_relu(x, w, b, g, be))
    ref = reference(x, w, b, g, be)
    assert out.shape == (8, 16)
    assert jnp.allclose(out, ref, atol=2e-3, rtol=2e-3), "case 1 (fused) mismatch"

    # Case 2: ragged batch, multi-tile fused path (exercises the padded-row mask and
    # multiple K / N tiles while the whole batch column stays resident in VMEM).
    x, w, b, g, be = _make_inputs(k2, 20, 320, 192)
    out = jax.block_until_ready(linear_bn_relu(x, w, b, g, be, tn=128, tk=128))
    ref = reference(x, w, b, g, be)
    assert out.shape == (20, 192)
    assert jnp.allclose(out, ref, atol=2e-3, rtol=2e-3), "case 2 (fused) mismatch"

    # Case 3: force the two-phase fallback (large-batch path): cross-tile masked
    # statistics reduction, bf16 intermediate, separate BN+ReLU streaming pass.
    x, w, b, g, be = _make_inputs(k3, 20, 320, 192)
    out = jax.block_until_ready(
        linear_bn_relu(x, w, b, g, be, tm=16, tn=128, tk=128, fused=False))
    ref = reference(x, w, b, g, be, bf16_intermediate=True)
    assert out.shape == (20, 192)
    assert jnp.allclose(out, ref, atol=2e-3, rtol=2e-3), "case 3 (two-phase) mismatch"

    print("KERNEL_OK")
</pallas_src>

<mosaic_0001>
module attributes {stable_mosaic.version = 11 : i64} {
  func.func @_fused_kernel(%arg0: i32, %arg1: i32, %arg2: memref<16x128xbf16, #tpu.memory_space<vmem>>, %arg3: memref<128x128xbf16, #tpu.memory_space<vmem>>, %arg4: memref<1x128xf32, #tpu.memory_space<vmem>>, %arg5: memref<1x128xf32, #tpu.memory_space<vmem>>, %arg6: memref<1x128xf32, #tpu.memory_space<vmem>>, %arg7: memref<16x128xf32, #tpu.memory_space<vmem>>) attributes {dimension_semantics = [#tpu.dimension_semantics<parallel>, #tpu.dimension_semantics<arbitrary>], iteration_bounds = array<i64: 1, 1>, scalar_prefetch = 0 : i64, scratch_operands = 0 : i64, tpu.core_type = #tpu.core_type<tc>, window_params = [{transform_indices = @transform_0, window_bounds = array<i64: 16, 128>}, {transform_indices = @transform_1, window_bounds = array<i64: 128, 128>}, {transform_indices = @transform_2, window_bounds = array<i64: 1, 128>}, {transform_indices = @transform_3, window_bounds = array<i64: 1, 128>}, {transform_indices = @transform_4, window_bounds = array<i64: 1, 128>}, {transform_indices = @transform_5, window_bounds = array<i64: 16, 128>}]} {
    %c0_i32 = arith.constant 0 : i32
    %0 = arith.cmpi eq, %arg1, %c0_i32 : i32
    %1 = arith.extui %0 : i1 to i32
    %c0_i32_0 = arith.constant 0 : i32
    %2 = arith.cmpi ne, %1, %c0_i32_0 : i32
    scf.if %2 {
      %c0_10 = arith.constant 0 : index
      %c0_11 = arith.constant 0 : index
      %12 = vector.load %arg4[%c0_10, %c0_11] : memref<1x128xf32, #tpu.memory_space<vmem>>, vector<1x128xf32>
      %13 = vector.shape_cast %12 : vector<1x128xf32> to vector<1x128xf32>
      %14 = vector.broadcast %13 : vector<1x128xf32> to vector<16x128xf32>
      %c0_12 = arith.constant 0 : index
      %c0_13 = arith.constant 0 : index
      %15 = vector.load %arg7[%c0_12, %c0_13] : memref<16x128xf32, #tpu.memory_space<vmem>>, vector<16x128xf32>
      tpu.vector_store %arg7[%c0_12, %c0_13], %14 {strides = array<i32>} : memref<16x128xf32, #tpu.memory_space<vmem>>, vector<16x128xf32>,
    } else {
    }
    %c0 = arith.constant 0 : index
    %c0_1 = arith.constant 0 : index
    %3 = vector.load %arg7[%c0, %c0_1] : memref<16x128xf32, #tpu.memory_space<vmem>>, vector<16x128xf32>
    %c0_2 = arith.constant 0 : index
    %c0_3 = arith.constant 0 : index
    %4 = vector.load %arg2[%c0_2, %c0_3] : memref<16x128xbf16, #tpu.memory_space<vmem>>, vector<16x128xbf16>
    %c0_4 = arith.constant 0 : index
    %c0_5 = arith.constant 0 : index
    %5 = vector.load %arg3[%c0_4, %c0_5] : memref<128x128xbf16, #tpu.memory_space<vmem>>, vector<128x128xbf16>
    %cst = arith.constant dense<0.000000e+00> : vector<16x128xf32>
    %6 = tpu.matmul %4, %5, %cst {dimension_numbers = #tpu.dot_dimension_numbers<[1], [0], [0], [1], [0, 0, 1, 1], [], []>} : vector<16x128xbf16>, vector<128x128xbf16>, vector<16x128xf32> -> vector<16x128xf32>
    %7 = arith.addf %3, %6 : vector<16x128xf32>
    %c0_6 = arith.constant 0 : index
    %c0_7 = arith.constant 0 : index
    %8 = vector.load %arg7[%c0_6, %c0_7] : memref<16x128xf32, #tpu.memory_space<vmem>>, vector<16x128xf32>
    tpu.vector_store %arg7[%c0_6, %c0_7], %7 {strides = array<i32>} : memref<16x128xf32, #tpu.memory_space<vmem>>, vector<16x128xf32>,
    %c0_i32_8 = arith.constant 0 : i32
    %9 = arith.cmpi eq, %arg1, %c0_i32_8 : i32
    %10 = arith.extui %9 : i1 to i32
    %c0_i32_9 = arith.constant 0 : i32
    %11 = arith.cmpi ne, %10, %c0_i32_9 : i32
    scf.if %11 {
      %c0_10 = arith.constant 0 : index
      %c0_11 = arith.constant 0 : index
      %12 = vector.load %arg7[%c0_10, %c0_11] : memref<16x128xf32, #tpu.memory_space<vmem>>, vector<16x128xf32>
      %13 = tpu.iota {dimensions = array<i32: 0>} : vector<16x1xi32>
      %c8_i32 = arith.constant 8 : i32
      %14 = vector.broadcast %c8_i32 : i32 to vector<16x1xi32>
      %15 = arith.cmpi slt, %13, %14 : vector<16x1xi32>
      %cst_12 = arith.constant 0.000000e+00 : f32
      %16 = vector.shape_cast %15 : vector<16x1xi1> to vector<16x1xi1>
      %17 = vector.broadcast %16 : vector<16x1xi1> to vector<16x128xi1>
      %18 = vector.broadcast %cst_12 : f32 to vector<16x128xf32>
      %19 = arith.select %17, %12, %18 : vector<16x128xi1>, vector<16x128xf32>
      %cst_13 = arith.constant dense<0.000000e+00> : vector<128xf32>
      %20 = vector.multi_reduction <add>, %19, %cst_13 [0] : vector<16x128xf32> to vector<128xf32>
      %21 = vector.shape_cast %20 : vector<128xf32> to vector<1x128xf32>
      %cst_14 = arith.constant 1.250000e-01 : f32
      %22 = vector.broadcast %cst_14 : f32 to vector<1x128xf32>
      %23 = arith.mulf %21, %22 : vector<1x128xf32>
      %24 = arith.mulf %19, %19 : vector<16x128xf32>
      %cst_15 = arith.constant dense<0.000000e+00> : vector<128xf32>
      %25 = vector.multi_reduction <add>, %24, %cst_15 [0] : vector<16x128xf32> to vector<128xf32>
      %26 = vector.shape_cast %25 : vector<128xf32> to vector<1x128xf32>
      %cst_16 = arith.constant 1.250000e-01 : f32
      %27 = vector.broadcast %cst_16 : f32 to vector<1x128xf32>
      %28 = arith.mulf %26, %27 : vector<1x128xf32>
      %29 = arith.mulf %23, %23 : vector<1x128xf32>
      %30 = arith.subf %28, %29 : vector<1x128xf32>
      %cst_17 = arith.constant 0.000000e+00 : f32
      %31 = vector.broadcast %cst_17 : f32 to vector<1x128xf32>
      %32 = arith.maximumf %30, %31 : vector<1x128xf32>
      %cst_18 = arith.constant 9.99999974E-6 : f32
      %33 = vector.broadcast %cst_18 : f32 to vector<1x128xf32>
      %34 = arith.addf %32, %33 : vector<1x128xf32>
      %35 = math.rsqrt %34 : vector<1x128xf32>
      %c0_19 = arith.constant 0 : index
      %c0_20 = arith.constant 0 : index
      %36 = vector.load %arg5[%c0_19, %c0_20] : memref<1x128xf32, #tpu.memory_space<vmem>>, vector<1x128xf32>
      %37 = arith.mulf %36, %35 : vector<1x128xf32>
      %c0_21 = arith.constant 0 : index
      %c0_22 = arith.constant 0 : index
      %38 = vector.load %arg6[%c0_21, %c0_22] : memref<1x128xf32, #tpu.memory_space<vmem>>, vector<1x128xf32>
      %39 = arith.mulf %23, %37 : vector<1x128xf32>
      %40 = arith.subf %38, %39 : vector<1x128xf32>
      %41 = vector.broadcast %37 : vector<1x128xf32> to vector<16x128xf32>
      %42 = arith.mulf %12, %41 : vector<16x128xf32>
      %43 = vector.broadcast %40 : vector<1x128xf32> to vector<16x128xf32>
      %44 = arith.addf %42, %43 : vector<16x128xf32>
      %cst_23 = arith.constant 0.000000e+00 : f32
      %45 = vector.broadcast %cst_23 : f32 to vector<16x128xf32>
      %46 = arith.maximumf %44, %45 : vector<16x128xf32>
      %c0_24 = arith.constant 0 : index
      %c0_25 = arith.constant 0 : index
      %47 = vector.load %arg7[%c0_24, %c0_25] : memref<16x128xf32, #tpu.memory_space<vmem>>, vector<16x128xf32>
      tpu.vector_store %arg7[%c0_24, %c0_25], %46 {strides = array<i32>} : memref<16x128xf32, #tpu.memory_space<vmem>>, vector<16x128xf32>,
    } else {
    }
    return
  }
  func.func @transform_0(%arg0: i32, %arg1: i32) -> (i32, i32) {
    %c0_i32 = arith.constant 0 : i32
    %c0_i32_0 = arith.constant 0 : i32
    return %c0_i32, %arg1 : i32, i32
  }
  func.func @transform_1(%arg0: i32, %arg1: i32) -> (i32, i32) {
    %c0_i32 = arith.constant 0 : i32
    return %arg1, %arg0 : i32, i32
  }
  func.func @transform_2(%arg0: i32, %arg1: i32) -> (i32, i32) {
    %c0_i32 = arith.constant 0 : i32
    %c0_i32_0 = arith.constant 0 : i32
    return %c0_i32, %arg0 : i32, i32
  }
  func.func @transform_3(%arg0: i32, %arg1: i32) -> (i32, i32) {
    %c0_i32 = arith.constant 0 : i32
    %c0_i32_0 = arith.constant 0 : i32
    return %c0_i32, %arg0 : i32, i32
  }
  func.func @transform_4(%arg0: i32, %arg1: i32) -> (i32, i32) {
    %c0_i32 = arith.constant 0 : i32
    %c0_i32_0 = arith.constant 0 : i32
    return %c0_i32, %arg0 : i32, i32
  }
  func.func @transform_5(%arg0: i32, %arg1: i32) -> (i32, i32) {
    %c0_i32 = arith.constant 0 : i32
    %c0_i32_0 = arith.constant 0 : i32
    return %c0_i32, %arg0 : i32, i32
  }
}

</mosaic_0001>

<bundles_post_ra>
// kernel: linear_bn_relu.1
= control target key start
LH: loop header
LB: loop body
LE: loop exit
PB: predicated region body
PF: predicated region fallthrough
CT: control target
= control target key end

     0   :  { %v273_v0 = vmov 0.0   ;;  %vm274_vm0 = vmmov 0   ;;  %v198_v35 = vlaneseq  ;;  %s347_s1 = inlined_call_operand.vmem [shape: bf16[128,128], index: 1, kind: input, shape index: {}]   ;;  %s348_s0 = inlined_call_operand.vmem [shape: bf16[16,128], index: 0, kind: input, shape index: {}]   ;;  %s349_s2 = inlined_call_operand.vmem [shape: f32[1,128], index: 2, kind: input, shape index: {}]   ;;  %s350_s3 = inlined_call_operand.vmem [shape: f32[1,128], index: 3, kind: input, shape index: {}]   ;;  %s351_s4 = inlined_call_operand.vmem [shape: f32[1,128], index: 4, kind: input, shape index: {}]   ;;  %s352_s5 = inlined_call_operand.vmem [shape: f32[16,128], index: 5, kind: output, shape index: {}]  }
   0x1   :  { %240 = vmatprep.subr.bf16.mxu0 %v273_v0  ;;  %v262_v1 = vld [vmem:[%s347_s1 + $0x38] sm:$0xff]   ;;  %256 = vmatprep.mubr.msk.bf16.mxu0 %vm274_vm0, %v273_v0  ;;  %v263_v2 = vld [vmem:[%s347_s1 + $0x30] sm:$0xff]   ;;  %v264_v3 = vld [vmem:[%s347_s1 + $0x28] sm:$0xff]  }
   0x2   :  { %241 = vmatpush3.bf16.msra.mxu0 %v262_v1  ;;  %v265_v4 = vld [vmem:[%s347_s1 + $0x20] sm:$0xff]   ;;  %v266_v5 = vld [vmem:[%s347_s1 + $0x18] sm:$0xff]   ;;  %v267_v6 = vld [vmem:[%s347_s1 + $0x10] sm:$0xff]   ;;  %v199_v36 = vshrl.u32 %v198_v35, 7 }
   0x3   :  { %242 = vmatprep.subr.bf16.mxu0 %v273_v0  ;;  %v268_v7 = vld [vmem:[%s347_s1 + $0x8] sm:$0xff]   ;;  %v269_v8 = vld [vmem:[%s347_s1] sm:$0xff]  }
   0x4   :  { %v270_v9 = vld [vmem:[%s348_s0] sm:$0xff]   ;;  %v200_v38 = vsub.s32 0, %v199_v36 }
   0x5   :  { %v221_v10 = vld [vmem:[%s349_s2] ss:$0 sm:$0xff] }
   0x6   :  { %243 = vmatpush3.bf16.msra.mxu0 %v263_v2  ;;  %v192_v37 = vld [vmem:[%s350_s3] sm:$0x1] }
   0x7   :  { %244 = vmatprep.subr.bf16.mxu0 %v273_v0  ;;  %v194_v41 = vld [vmem:[%s351_s4] sm:$0x1] }
   0xa   :  { %245 = vmatpush3.bf16.msra.mxu0 %v264_v3 }
   0xb   :  { %246 = vmatprep.subr.bf16.mxu0 %v273_v0 }
   0xe   :  { %247 = vmatpush3.bf16.msra.mxu0 %v265_v4 }
   0xf   :  { %248 = vmatprep.subr.bf16.mxu0 %v273_v0 }
  0x12   :  { %249 = vmatpush3.bf16.msra.mxu0 %v266_v5 }
  0x13   :  { %250 = vmatprep.subr.bf16.mxu0 %v273_v0 }
  0x16   :  { %251 = vmatpush3.bf16.msra.mxu0 %v267_v6 }
  0x17   :  { %252 = vmatprep.subr.bf16.mxu0 %v273_v0 }
  0x1a   :  { %253 = vmatpush3.bf16.msra.mxu0 %v268_v7 }
  0x1b   :  { %254 = vmatprep.subr.bf16.mxu0 %v273_v0 }
  0x1e   :  { %255 = vmatpush3.bf16.msra.mxu0 %v269_v8 }
  0x21   :  { %257 = vmatmul.mubr.bf16.vlgmr.msra.gmra.mxu0 %v270_v9 }
  0xe1   :  { %v142_v11 = vpop.f32.mrf.mxu0 }
  0xe2   :  { %v149_v12 = vadd.f32 %v221_v10, %v142_v11 }
  0xe3   :  { %v258_v13 = vpop.f32.mrf.mxu0 }
  0xe4   :  { %v170_v14 = vrot.slane %v149_v12, 4  ;;  %v177_v15 = vmul.f32 %v149_v12, %v149_v12 }
  0xe5   :  { %v145_v16 = vpop.f32.mrf.mxu0 }
  0xe6   :  { %v171_v17 = vadd.f32 %v170_v14, %v149_v12  ;;  %v180_v18 = vrot.slane %v177_v15, 4  ;;  %v150_v45 = vadd.f32 %v221_v10, %v145_v16 }
  0xe7   :  { %v259_v19 = vpop.f32.mrf.mxu0 }
  0xe8   :  { %v172_v20 = vrot.slane %v171_v17, 2  ;;  %v181_v21 = vadd.f32 %v180_v18, %v177_v15 }
  0xea   :  { %v173_v22 = vadd.f32 %v172_v20, %v171_v17  ;;  %v182_v23 = vrot.slane %v181_v21, 2 }
  0xec   :  { %v174_v24 = vrot.slane %v173_v22, 1  ;;  %v183_v25 = vadd.f32 %v182_v23, %v181_v21 }
  0xee   :  { %v175_v26 = vadd.f32 %v174_v24, %v173_v22  ;;  %v184_v27 = vrot.slane %v183_v25, 1 }
  0xf0   :  { %v176_v28 = vmul.f32 0.125, %v175_v26  ;;  %v185_v29 = vadd.f32 %v184_v27, %v183_v25 }
  0xf2   :  { %v186_v30 = vmul.f32 0.125, %v185_v29  ;;  %v187_v31 = vmul.f32 %v176_v28, %v176_v28 }
  0xf4   :  { %v188_v32 = vsub.f32 %v186_v30, %v187_v31 }
  0xf6   :  { %v189_v33 = vmax.f32 %v188_v32, 0.0 }
  0xf8   :  { %v190_v34 = vadd.f32 1e-05, %v189_v33 }
  0xfa   :  { %271 = vrsqrt.f32 %v190_v34 }
 0x107   :  { %v272_v39 = vpop.eup %271 }
 0x108   :  { %v193_v40 = vmul.f32 %v272_v39, %v192_v37 }
 0x10a   :  { %v195_v42 = vmul.f32 %v193_v40, %v176_v28  ;;  %v201_v43 = vrot.slane %v193_v40, %v200_v38 }
 0x10c   :  { %v196_v44 = vsub.f32 %v194_v41, %v195_v42  ;;  %v203_v46 = vmul.f32 %v201_v43, %v149_v12  ;;  %v204_v48 = vmul.f32 %v201_v43, %v150_v45 }
 0x10e   :  { %v209_v47 = vrot.slane %v196_v44, %v200_v38 }
 0x110   :  { %v211_v49 = vadd.f32 %v209_v47, %v203_v46  ;;  %v212_v50 = vadd.f32 %v209_v47, %v204_v48 }
 0x112   :  { %v213_v51 = vmax.f32 %v211_v49, 0.0  ;;  %v214_v52 = vmax.f32 %v212_v50, 0.0 }
 0x114   :  { %215 = vst [vmem:[%s352_s5] sm:$0xff] %v213_v51  ;;  %216 = vst [vmem:[%s352_s5 + $0x8] sm:$0xff] %v214_v52 }

</bundles_post_ra>
